<compile_context>
chip_gen: v5e
topology: v5e:2x2
jax: 0.10.0
libtpu: 0.0.40
codegen_flags: <defaults>
</compile_context>

<pallas_src>
import functools

import jax
import jax.numpy as jnp
from jax.experimental import pallas as pl
from jax.experimental.pallas import tpu as pltpu

NUM_CLASSES = 2
MAX_BATCH_TILE = 512          # rows per grid step (sweep point from perf review)


def _window_agg_kernel(x_ref, w1_ref, b1_ref, w2_ref, b2_ref, o_ref):
    # x_ref : (BT, NW, D)   raw activation tile (no wrapper-side augmentation)
    # w1_ref: (D, H)        pre-scaled by 1/NW (mean folded into the weights)
    # b1_ref: (1, H)
    # w2_ref: (H, C)
    # b2_ref: (1, C)
    # o_ref : (BT, C)
    # Sum over windows (XLU sublane reduce); f32 accumulation.
    x_sum = jnp.sum(x_ref[...].astype(jnp.float32), axis=1)              # (BT, D)
    # Layer 1 (+ bias, ReLU): mean folded into w1, so sum @ (w1/NW) == mean @ w1.
    h = jnp.dot(x_sum, w1_ref[...], preferred_element_type=jnp.float32)
    h = jnp.maximum(h + b1_ref[...], 0.0)                                # (BT, H)
    # Layer 2 (+ bias).
    out = jnp.dot(h, w2_ref[...], preferred_element_type=jnp.float32)
    o_ref[...] = (out + b2_ref[...]).astype(o_ref.dtype)


def _pick_tiling(batch):
    """Pick (batch_tile, padded_batch) with tile mult-of-8, >=2 grid steps when possible."""
    if batch <= 8:
        return 8, 8
    grid = max(2, -(-batch // MAX_BATCH_TILE))        # keep >=2 steps for v7x megacore
    bt = ((-(-batch // grid)) + 7) // 8 * 8           # ceil(batch/grid) rounded up to 8
    return bt, bt * grid


@jax.jit
def window_aggregator_batched(cls_tokens, w1, b1, w2, b2):
    """cls_tokens: (B, num_windows, d_model) -> logits: (B, 2)."""
    B, NW, D = cls_tokens.shape
    H = w1.shape[1]
    C = NUM_CLASSES

    bt, B_pad = _pick_tiling(B)
    grid = (B_pad // bt,)

    # One-time (jit-cached) parameter prep: fold 1/NW mean scale into w1.
    w1_s = w1.astype(jnp.float32) * (1.0 / NW)         # (D, H)
    b1_r = b1.astype(jnp.float32).reshape(1, H)
    w2_f = w2.astype(jnp.float32)                      # (H, C)
    b2_r = b2.astype(jnp.float32).reshape(1, C)

    x = cls_tokens
    if B_pad != B:
        x = jnp.pad(x, ((0, B_pad - B), (0, 0), (0, 0)))

    itemsize = jnp.dtype(x.dtype).itemsize
    cost = pl.CostEstimate(
        flops=2 * B_pad * (D * H + H * C) + B_pad * NW * D,
        transcendentals=0,
        bytes_accessed=B_pad * NW * D * itemsize
        + (D * H + H + H * C + C) * 4
        + B_pad * C * 4,
    )

    out = pl.pallas_call(
        _window_agg_kernel,
        out_shape=jax.ShapeDtypeStruct((B_pad, C), jnp.float32),
        grid_spec=pltpu.PrefetchScalarGridSpec(
            num_scalar_prefetch=0,
            grid=grid,
            in_specs=[
                # per-step batch tile of activations
                pl.BlockSpec((bt, NW, D), lambda i: (i, 0, 0)),
                # parameters: constant block index -> DMA'd once, VMEM-resident
                pl.BlockSpec((D, H), lambda i: (0, 0)),
                pl.BlockSpec((1, H), lambda i: (0, 0)),
                pl.BlockSpec((H, C), lambda i: (0, 0)),
                pl.BlockSpec((1, C), lambda i: (0, 0)),
            ],
            out_specs=pl.BlockSpec((bt, C), lambda i: (i, 0)),
        ),
        compiler_params=pltpu.CompilerParams(
            dimension_semantics=("parallel",),   # shard batch across v7x TensorCores
        ),
        cost_estimate=cost,
    )(x, w1_s, b1_r, w2_f, b2_r)

    return out[:B]


def window_aggregator(cls_tokens, w1, b1, w2, b2):
    """Exact module semantics: (num_windows, d_model) -> (2,)."""
    return window_aggregator_batched(cls_tokens[None], w1, b1, w2, b2)[0]


if __name__ == "__main__":
    # Small shapes consistent with the module: num_windows=8, d_model=32, hidden=64.
    num_windows, d_model, hidden_dim = 8, 32, 64
    batch = 16   # grid = 2 steps even at this small size

    key = jax.random.PRNGKey(0)
    k_x, k_w1, k_b1, k_w2, k_b2 = jax.random.split(key, 5)

    cls_batch = jax.random.normal(k_x, (batch, num_windows, d_model), dtype=jnp.float32)

    # Parameters stored as (in, out) so the kernel computes x @ W + b.
    w1 = jax.random.normal(k_w1, (d_model, hidden_dim), dtype=jnp.float32) * (d_model ** -0.5)
    b1 = jax.random.normal(k_b1, (hidden_dim,), dtype=jnp.float32) * 0.01
    w2 = jax.random.normal(k_w2, (hidden_dim, 2), dtype=jnp.float32) * (hidden_dim ** -0.5)
    b2 = jax.random.normal(k_b2, (2,), dtype=jnp.float32) * 0.01

    # Batched kernel run.
    logits_b = jax.block_until_ready(window_aggregator_batched(cls_batch, w1, b1, w2, b2))

    # Reference (same math as the PyTorch forward), vmapped over the batch.
    def ref_one(x):
        mean_cls = jnp.mean(x, axis=0)
        return jnp.maximum(mean_cls @ w1 + b1, 0.0) @ w2 + b2

    ref_b = jax.vmap(ref_one)(cls_batch)
    assert logits_b.shape == (batch, 2)
    assert jnp.allclose(logits_b, ref_b, atol=1e-4, rtol=1e-4), (logits_b, ref_b)

    # Single-sample path (original module signature).
    logits_1 = jax.block_until_ready(window_aggregator(cls_batch[0], w1, b1, w2, b2))
    assert logits_1.shape == (2,)
    assert jnp.allclose(logits_1, ref_one(cls_batch[0]), atol=1e-4, rtol=1e-4)

    print("KERNEL_OK")
</pallas_src>

<mosaic_0001>
module attributes {stable_mosaic.version = 11 : i64} {
  func.func @_window_agg_kernel(%arg0: i32, %arg1: memref<8x8x32xf32, #tpu.memory_space<vmem>>, %arg2: memref<32x64xf32, #tpu.memory_space<vmem>>, %arg3: memref<1x64xf32, #tpu.memory_space<vmem>>, %arg4: memref<64x2xf32, #tpu.memory_space<vmem>>, %arg5: memref<1x2xf32, #tpu.memory_space<vmem>>, %arg6: memref<8x2xf32, #tpu.memory_space<vmem>>) attributes {dimension_semantics = [#tpu.dimension_semantics<parallel>], iteration_bounds = array<i64: 2>, scalar_prefetch = 0 : i64, scratch_operands = 0 : i64, tpu.core_type = #tpu.core_type<tc>, window_params = [{transform_indices = @transform_0, window_bounds = array<i64: 8, 8, 32>}, {pipeline_mode = #tpu.pipeline_mode<synchronous>, transform_indices = @transform_1, window_bounds = array<i64: 32, 64>}, {pipeline_mode = #tpu.pipeline_mode<synchronous>, transform_indices = @transform_2, window_bounds = array<i64: 1, 64>}, {pipeline_mode = #tpu.pipeline_mode<synchronous>, transform_indices = @transform_3, window_bounds = array<i64: 64, 2>}, {pipeline_mode = #tpu.pipeline_mode<synchronous>, transform_indices = @transform_4, window_bounds = array<i64: 1, 2>}, {transform_indices = @transform_5, window_bounds = array<i64: 8, 2>}]} {
    %c0 = arith.constant 0 : index
    %c0_0 = arith.constant 0 : index
    %c0_1 = arith.constant 0 : index
    %0 = vector.load %arg1[%c0, %c0_0, %c0_1] : memref<8x8x32xf32, #tpu.memory_space<vmem>>, vector<8x8x32xf32>
    %cst = arith.constant dense<0.000000e+00> : vector<8x32xf32>
    %1 = vector.multi_reduction <add>, %0, %cst [1] : vector<8x8x32xf32> to vector<8x32xf32>
    %c0_2 = arith.constant 0 : index
    %c0_3 = arith.constant 0 : index
    %2 = vector.load %arg2[%c0_2, %c0_3] : memref<32x64xf32, #tpu.memory_space<vmem>>, vector<32x64xf32>
    %cst_4 = arith.constant dense<0.000000e+00> : vector<8x64xf32>
    %3 = tpu.matmul %1, %2, %cst_4 {dimension_numbers = #tpu.dot_dimension_numbers<[1], [0], [0], [1], [0, 0, 1, 1], [], []>} : vector<8x32xf32>, vector<32x64xf32>, vector<8x64xf32> -> vector<8x64xf32>
    %c0_5 = arith.constant 0 : index
    %c0_6 = arith.constant 0 : index
    %4 = vector.load %arg3[%c0_5, %c0_6] : memref<1x64xf32, #tpu.memory_space<vmem>>, vector<1x64xf32>
    %5 = vector.broadcast %4 : vector<1x64xf32> to vector<8x64xf32>
    %6 = arith.addf %3, %5 : vector<8x64xf32>
    %cst_7 = arith.constant 0.000000e+00 : f32
    %7 = vector.broadcast %cst_7 : f32 to vector<8x64xf32>
    %8 = arith.maximumf %6, %7 : vector<8x64xf32>
    %c0_8 = arith.constant 0 : index
    %c0_9 = arith.constant 0 : index
    %9 = vector.load %arg4[%c0_8, %c0_9] : memref<64x2xf32, #tpu.memory_space<vmem>>, vector<64x2xf32>
    %cst_10 = arith.constant dense<0.000000e+00> : vector<8x2xf32>
    %10 = tpu.matmul %8, %9, %cst_10 {dimension_numbers = #tpu.dot_dimension_numbers<[1], [0], [0], [1], [0, 0, 1, 1], [], []>} : vector<8x64xf32>, vector<64x2xf32>, vector<8x2xf32> -> vector<8x2xf32>
    %c0_11 = arith.constant 0 : index
    %c0_12 = arith.constant 0 : index
    %11 = vector.load %arg5[%c0_11, %c0_12] : memref<1x2xf32, #tpu.memory_space<vmem>>, vector<1x2xf32>
    %12 = vector.broadcast %11 : vector<1x2xf32> to vector<8x2xf32>
    %13 = arith.addf %10, %12 : vector<8x2xf32>
    %c0_13 = arith.constant 0 : index
    %c0_14 = arith.constant 0 : index
    %14 = vector.load %arg6[%c0_13, %c0_14] : memref<8x2xf32, #tpu.memory_space<vmem>>, vector<8x2xf32>
    tpu.vector_store %arg6[%c0_13, %c0_14], %13 {strides = array<i32>} : memref<8x2xf32, #tpu.memory_space<vmem>>, vector<8x2xf32>,
    return
  }
  func.func @transform_0(%arg0: i32) -> (i32, i32, i32) {
    %c0_i32 = arith.constant 0 : i32
    %c0_i32_0 = arith.constant 0 : i32
    %c0_i32_1 = arith.constant 0 : i32
    return %arg0, %c0_i32, %c0_i32_0 : i32, i32, i32
  }
  func.func @transform_1(%arg0: i32) -> (i32, i32) {
    %c0_i32 = arith.constant 0 : i32
    %c0_i32_0 = arith.constant 0 : i32
    %c0_i32_1 = arith.constant 0 : i32
    return %c0_i32, %c0_i32_0 : i32, i32
  }
  func.func @transform_2(%arg0: i32) -> (i32, i32) {
    %c0_i32 = arith.constant 0 : i32
    %c0_i32_0 = arith.constant 0 : i32
    %c0_i32_1 = arith.constant 0 : i32
    return %c0_i32, %c0_i32_0 : i32, i32
  }
  func.func @transform_3(%arg0: i32) -> (i32, i32) {
    %c0_i32 = arith.constant 0 : i32
    %c0_i32_0 = arith.constant 0 : i32
    %c0_i32_1 = arith.constant 0 : i32
    return %c0_i32, %c0_i32_0 : i32, i32
  }
  func.func @transform_4(%arg0: i32) -> (i32, i32) {
    %c0_i32 = arith.constant 0 : i32
    %c0_i32_0 = arith.constant 0 : i32
    %c0_i32_1 = arith.constant 0 : i32
    return %c0_i32, %c0_i32_0 : i32, i32
  }
  func.func @transform_5(%arg0: i32) -> (i32, i32) {
    %c0_i32 = arith.constant 0 : i32
    %c0_i32_0 = arith.constant 0 : i32
    return %arg0, %c0_i32 : i32, i32
  }
}

</mosaic_0001>

<bundles_post_ra>
// kernel: window_aggregator_batched.1
= control target key start
LH: loop header
LB: loop body
LE: loop exit
PB: predicated region body
PF: predicated region fallthrough
CT: control target
= control target key end

     0   :  { %s494_s18 = smov 0   ;;  %s570_s0 = inlined_call_operand.vmem [shape: f32[16,8,32], index: 0, kind: input, shape index: {}]   ;;  %s571_s1 = inlined_call_operand.vmem [shape: f32[32,64], index: 1, kind: input, shape index: {}]   ;;  %s572_s2 = inlined_call_operand.vmem [shape: f32[1,64], index: 2, kind: input, shape index: {}]   ;;  %s573_s3 = inlined_call_operand.vmem [shape: f32[64,2], index: 3, kind: input, shape index: {}]   ;;  %s574_s4 = inlined_call_operand.vmem [shape: f32[1,2], index: 4, kind: input, shape index: {}]   ;;  %s575_s5 = inlined_call_operand.vmem [shape: f32[16,2], index: 5, kind: output, shape index: {}]  }
   0x1 LB: > { %s500_s19 = sadd.s32 4294967295, %s462_s18   ;;  %p438_p0 = scmp.ge.s32.totalorder %s462_s18, 1  ;;  %s462_s18 = sphi %s494_s18, %s15_s18  }
   0x2   : > { %p188_p1 = scmp.lt.s32.totalorder %s462_s18, 3 }
   0x4   : > { %p189_p2 = pnand %p438_p0, %p188_p1 }
   0x5   : > { %s439_s24 = sshll.u32 (!%p189_p2), %s500_s19, 3  ;;  %p221_p4 = scmp.lt.s32.totalorder (!%p189_p2), %s500_s19, 1 }
   0x6   : > { %192 = sbr.rel (%p189_p2) target bundleno = 294 (0x126), region = 40  ;;  %p216_p3 = scmp.lt.s32.totalorder (!%p189_p2), %s439_s24, 15 }
   0xb   : > { %v293_v0 = vld [vmem:[%s571_s1 + $0x18] sm:$0xff]  ;;  %v292_v1 = vld [vmem:[%s571_s1 + $0x10] sm:$0xff]  ;;  %v291_v2 = vld [vmem:[%s571_s1 + $0x8] sm:$0xff]  ;;  %s577_s24 = smov (!%p216_p3, %s439_s24), 15  ;;  %vm233_vm0 = vcmask 261120   ;;  %vm306_vm1 = vcmask 1041409  }
   0xc   : > { %334 = vmatpush.msra.mxu0 %v293_v0  ;;  %v350_v3 = vld [vmem:[%s573_s3 + $0x38] sm:$0xff]  ;;  %v349_v4 = vld [vmem:[%s573_s3 + $0x30] sm:$0xff]  ;;  %v290_v5 = vld [vmem:[%s571_s1] sm:$0xff]  ;;  %s440_s10 = sshll.u32 %s577_s24, 3  ;;  %vm308_vm2 = vcmask 1042434   ;;  %vm310_vm3 = vcmask 1043459  }
   0xd   : > { %367 = vmatpush.msra.mxu1 %v350_v3  ;;  %v348_v6 = vld [vmem:[%s573_s3 + $0x28] sm:$0xff]  ;;  %s219_s13 = scalar_lea.vmem %s570_s0, %s440_s10  ;;  %v347_v7 = vld [vmem:[%s573_s3 + $0x20] sm:$0xff]  ;;  %v346_v8 = vld [vmem:[%s573_s3 + $0x18] sm:$0xff]  ;;  %vm312_vm4 = vcmask 1044484   ;;  %vm314_vm5 = vcmask 1045509   ;;  %vm316_vm6 = vcmask 1046534  }
   0xe   : > { %335 = vmatpush.msra.mxu0 %v292_v1  ;;  %v225_v9 = vld [vmem:[%s219_s13] sm:$0xff]  ;;  %v226_v10 = vld [vmem:[%s219_s13 + $0x8] sm:$0xff]  ;;  %v227_v11 = vld [vmem:[%s219_s13 + $0x10] sm:$0xff]  ;;  %vm318_vm7 = vcmask 1047559   ;;  %vm355_vm8 = vcmask 523264   ;;  %s579_s19 = smov (!%p221_p4, %s500_s19), 1 }
   0xf   : > { %368 = vmatpush.msra.mxu1 %v349_v4  ;;  %v228_v12 = vld [vmem:[%s219_s13 + $0x18] sm:$0xff]  ;;  %v229_v13 = vld [vmem:[%s219_s13 + $0x20] sm:$0xff]  ;;  %v230_v14 = vld [vmem:[%s219_s13 + $0x28] sm:$0xff]  ;;  %v234_v15 = vsel %vm233_vm0, %v225_v9, 0.0  ;;  %v241_v16 = vsel %vm233_vm0, %v226_v10, 0.0  ;;  %v248_v17 = vsel %vm233_vm0, %v227_v11, 0.0 }
  0x10   : > { %336 = vmatpush.msra.mxu0 %v291_v2  ;;  %v231_v18 = vld [vmem:[%s219_s13 + $0x30] sm:$0xff]  ;;  %v232_v19 = vld [vmem:[%s219_s13 + $0x38] sm:$0xff]  ;;  %v235_v20 = vrot.slane %v234_v15, 4  ;;  %v242_v21 = vrot.slane %v241_v16, 4  ;;  %v249_v22 = vrot.slane %v248_v17, 4  ;;  %v255_v23 = vsel %vm233_vm0, %v228_v12, 0.0 }
  0x11   : > { %369 = vmatpush.msra.mxu1 %v348_v6  ;;  %v256_v24 = vrot.slane %v255_v23, 4  ;;  %v262_v25 = vsel %vm233_vm0, %v229_v13, 0.0  ;;  %v269_v26 = vsel %vm233_vm0, %v230_v14, 0.0  ;;  %v276_v27 = vsel %vm233_vm0, %v231_v18, 0.0  ;;  %v343_v18 = vld [vmem:[%s573_s3] sm:$0xff]  ;;  %s441_s28 = sshll.u32 %s579_s19, 3 }
  0x12   : > { %337 = vmatpush.msra.mxu0 %v290_v5  ;;  %v236_v28 = vadd.f32 %v235_v20, %v234_v15  ;;  %v243_v29 = vadd.f32 %v242_v21, %v241_v16  ;;  %v250_v30 = vadd.f32 %v249_v22, %v248_v17  ;;  %v263_v31 = vrot.slane %v262_v25, 4  ;;  %v345_v16 = vld [vmem:[%s573_s3 + $0x10] sm:$0xff]  ;;  %v344_v17 = vld [vmem:[%s573_s3 + $0x8] sm:$0xff]  ;;  %s224_s8 = scalar_lea.vmem %s575_s5, %s441_s28 }
  0x13   : > { %370 = vmatpush.msra.mxu1 %v347_v7  ;;  %v257_v32 = vadd.f32 %v256_v24, %v255_v23  ;;  %v270_v33 = vrot.slane %v269_v26, 4  ;;  %v277_v34 = vrot.slane %v276_v27, 4  ;;  %v283_v35 = vsel %vm233_vm0, %v232_v19, 0.0  ;;  %v454_v19 = vld [vmem:[%s572_s2] ss:$0 sm:$0xff] }
  0x14   : > { %v237_v36 = vrot.slane %v236_v28, 2  ;;  %v244_v37 = vrot.slane %v243_v29, 2  ;;  %v251_v38 = vrot.slane %v250_v30, 2  ;;  %v264_v39 = vadd.f32 %v263_v31, %v262_v25  ;;  %v455_v23 = vld [vmem:[%s574_s4] ss:$0 sm:$0xff] }
  0x15   : > { %371 = vmatpush.msra.mxu1 %v346_v8  ;;  %v258_v40 = vrot.slane %v257_v32, 2  ;;  %v271_v41 = vadd.f32 %v270_v33, %v269_v26  ;;  %v278_v42 = vadd.f32 %v277_v34, %v276_v27  ;;  %v284_v43 = vrot.slane %v283_v35, 4 }
  0x16   : > { %v238_v44 = vadd.f32 %v237_v36, %v236_v28  ;;  %v245_v45 = vadd.f32 %v244_v37, %v243_v29  ;;  %v252_v46 = vadd.f32 %v251_v38, %v250_v30  ;;  %v265_v47 = vrot.slane %v264_v39, 2 }
  0x17   : > { %v259_v48 = vadd.f32 %v258_v40, %v257_v32  ;;  %v272_v49 = vrot.slane %v271_v41, 2  ;;  %v279_v50 = vrot.slane %v278_v42, 2  ;;  %v285_v51 = vadd.f32 %v284_v43, %v283_v35  ;;  %372 = vmatpush.msra.mxu1 %v345_v16 }
  0x18   : > { %v239_v52 = vrot.slane %v238_v44, 1  ;;  %v246_v53 = vrot.slane %v245_v45, 1  ;;  %v253_v54 = vrot.slane %v252_v46, 1  ;;  %v266_v55 = vadd.f32 %v265_v47, %v264_v39 }
  0x19   : > { %v260_v56 = vrot.slane %v259_v48, 1  ;;  %v273_v57 = vadd.f32 %v272_v49, %v271_v41  ;;  %v280_v58 = vadd.f32 %v279_v50, %v278_v42  ;;  %v286_v59 = vrot.slane %v285_v51, 2  ;;  %373 = vmatpush.msra.mxu1 %v344_v17 }
  0x1a   : > { %v240_v60 = vadd.f32 %v239_v52, %v238_v44  ;;  %v247_v61 = vadd.f32 %v246_v53, %v245_v45  ;;  %v254_v62 = vadd.f32 %v253_v54, %v252_v46  ;;  %v267_v63 = vrot.slane %v266_v55, 1 }
  0x1b   : > { %v261_v0 = vadd.f32 %v260_v56, %v259_v48  ;;  %v274_v1 = vrot.slane %v273_v57, 1  ;;  %v281_v2 = vrot.slane %v280_v58, 1  ;;  %v287_v3 = vadd.f32 %v286_v59, %v285_v51  ;;  %374 = vmatpush.msra.mxu1 %v343_v18 }
  0x1c   : > { %v268_v4 = vadd.f32 %v267_v63, %v266_v55  ;;  %v307_v5 = vsel %vm306_vm1, %v247_v61, %v240_v60  ;;  %vm379_vm9 = vcmask 15360  }
  0x1d   : > { %v275_v6 = vadd.f32 %v274_v1, %v273_v57  ;;  %v282_v7 = vadd.f32 %v281_v2, %v280_v58  ;;  %v288_v8 = vrot.slane %v287_v3, 1  ;;  %v309_v9 = vsel %vm308_vm2, %v254_v62, %v307_v5 }
  0x1e   : > { %v311_v10 = vsel %vm310_vm3, %v261_v0, %v309_v9 }
  0x1f   : > { %v289_v11 = vadd.f32 %v288_v8, %v287_v3  ;;  %v313_v12 = vsel %vm312_vm4, %v268_v4, %v311_v10 }
  0x20   : > { %v315_v13 = vsel %vm314_vm5, %v275_v6, %v313_v12 }
  0x21   : > { %v317_v14 = vsel %vm316_vm6, %v282_v7, %v315_v13 }
  0x22   : > { %v319_v15 = vsel %vm318_vm7, %v289_v11, %v317_v14 }
  0x23   : > { %442 = vmatmul.msk.f32.vlgmr.msra.gmra.mxu0 %vm233_vm0, %v319_v15 }
  0xa0   : > { %v339_v20 = vpop.f32.mrf.mxu0 }
  0xa1   : > { %v340_v21 = vadd.f32 %v454_v19, %v339_v20 }
  0xa3   : > { %v342_v22 = vmax.f32 %v340_v21, 0.0 }
  0xa5   : > { %443 = vmatmul.msk.f32.vlgmr.msra.gmra.mxu1 %vm355_vm8, %v342_v22 }
 0x122   : > { %v376_v24 = vpop.f32.mrf.mxu1 }
 0x123   : > { %v377_v25 = vadd.f32 %v455_v23, %v376_v24 }
 0x125   : > { %380 = vst.msk [vmem:[%s224_s8] sm:$0xff] %vm379_vm9, %v377_v25 }
 0x126 PF: > { %s15_s18 = sadd.s32 1, %s462_s18  }
 0x127   : > { %p12_p5 = scmp.ge.s32.totalorder %s15_s18, 4  }
 0x129   :  { %14 = sbr.rel (!%p12_p5) target bundleno = 1 (0x1), region = 70 }

</bundles_post_ra>
